<compile_context>
chip_gen: v7x
topology: tpu7x:2x2x1
jax: 0.10.0
libtpu: 0.0.40
codegen_flags: <defaults>
</compile_context>

<pallas_src>
import functools
import math

import jax
import jax.numpy as jnp
from jax.experimental import pallas as pl
from jax.experimental.pallas import tpu as pltpu


# ---------------------------------------------------------------------------
# Fast path: (D, D) weight resident in VMEM (single-buffered); the grid only
# streams row tiles of x / out.  One MXU pass per row tile, lean epilogue.
# ---------------------------------------------------------------------------
def _residual_linear_resident_kernel(x_ref, w_ref, b_ref, o_ref, *, precision):
    x = x_ref[...]
    y = jnp.dot(x, w_ref[...], preferred_element_type=jnp.float32,
                precision=precision)
    y = y + b_ref[...].astype(jnp.float32) + x.astype(jnp.float32)
    o_ref[...] = y.astype(o_ref.dtype)


# ---------------------------------------------------------------------------
# Fallback: standard 3-axis tiled matmul (rows, out-cols, K) with an f32 VMEM
# accumulator; bias + residual fused in the pl.when epilogue.  Used when the
# resident (D, D) weight no longer fits the per-core VMEM budget.
# ---------------------------------------------------------------------------
def _residual_linear_tiled_kernel(x_ref, w_ref, xr_ref, b_ref, o_ref, acc_ref,
                                  *, precision):
    k = pl.program_id(2)

    @pl.when(k == 0)
    def _():
        acc_ref[...] = jnp.zeros_like(acc_ref)

    acc_ref[...] += jnp.dot(x_ref[...], w_ref[...],
                            preferred_element_type=jnp.float32,
                            precision=precision)

    @pl.when(k == pl.num_programs(2) - 1)
    def _():
        y = (acc_ref[...] + b_ref[...].astype(jnp.float32)
             + xr_ref[...].astype(jnp.float32))
        o_ref[...] = y.astype(o_ref.dtype)


def _round_up(v, m):
    return ((v + m - 1) // m) * m


def residual_linear(x, w, b, *, tm=512, force_tiled=False):
    """Residual(Linear): out = x @ w + b + x for x of shape [..., D].

    `w` is stored (in, out) — i.e. the transpose of PyTorch nn.Linear.weight —
    so the kernel computes x @ w directly.
    """
    orig_shape = x.shape
    D = orig_shape[-1]
    dtype = x.dtype
    itemsize = jnp.dtype(dtype).itemsize
    sublane = {4: 8, 2: 16, 1: 32}.get(itemsize, 8)
    lane = 128

    x2 = x.reshape(-1, D)
    N = x2.shape[0]

    # Feature dim: pad to a lane multiple only when not already aligned
    # (lane-dense stores).  Rows stay ragged — Pallas masks the tail block, so
    # there is no wrapper-side HBM round trip for the row dimension.
    d_pad = _round_up(D, lane)
    if d_pad != D:
        x2 = jnp.pad(x2, ((0, 0), (0, d_pad - D)))
        w_p = jnp.pad(w, ((0, d_pad - D), (0, d_pad - D)))
        b_p = jnp.pad(b, ((0, d_pad - D),))
    else:
        w_p, b_p = w, b
    b2 = b_p.reshape(1, d_pad)

    # Explicit matmul precision (TPU default for f32 is reduced / bf16 passes).
    precision = (jax.lax.Precision.HIGHEST if dtype == jnp.float32
                 else jax.lax.Precision.DEFAULT)

    # Generation-aware VMEM budget: ~7/8 of physical per-core VMEM
    # (~112 MiB on v5e/v6e, ~56 MiB on v7x) leaves headroom for Mosaic scratch.
    try:
        vmem_cap = int(pltpu.get_tpu_info().vmem_capacity_bytes)
    except Exception:  # pragma: no cover - conservative fallback
        vmem_cap = 64 << 20
    vmem_budget = (vmem_cap * 7) // 8
    headroom = 4 << 20

    # Row tile: large, sublane-aligned, not (much) larger than the row count,
    # and split so both v7x TensorCores get work when rows allow it.
    tm_eff = max(sublane, min(_round_up(tm, sublane), _round_up(N, sublane)))
    while -(-N // tm_eff) < 2 and tm_eff >= 2 * sublane:
        tm_eff = _round_up(max(sublane, tm_eff // 2), sublane)

    num_row_blocks = -(-N // tm_eff)
    # Regime-aware x pipelining: extra buffer hides per-step overhead in the
    # memory-bound (small-D) regime; keep 2 buffers when VMEM is precious.
    x_nbuf = 3 if (d_pad <= 1024 and num_row_blocks >= 3) else 2

    w_bytes = (d_pad * d_pad + d_pad) * itemsize

    def _resident_need(t):
        return w_bytes + (x_nbuf + 2) * t * d_pad * itemsize

    # Prefer shrinking the row tile over abandoning the resident-weight path.
    while _resident_need(tm_eff) + headroom > vmem_budget and tm_eff > 2 * sublane:
        tm_eff = _round_up(max(2 * sublane, tm_eff // 2), sublane)
    use_resident = (not force_tiled) and (
        _resident_need(tm_eff) + headroom <= vmem_budget)
    num_row_blocks = -(-N // tm_eff)

    cost = pl.CostEstimate(
        flops=2 * N * d_pad * d_pad,
        bytes_accessed=(2 * N * d_pad + d_pad * d_pad + d_pad) * itemsize,
        transcendentals=0,
    )

    if use_resident:
        vmem_limit = int(min(max(_resident_need(tm_eff) + headroom, 32 << 20),
                             vmem_budget))
        kernel = functools.partial(_residual_linear_resident_kernel,
                                   precision=precision)
        out = pl.pallas_call(
            kernel,
            out_shape=jax.ShapeDtypeStruct((N, d_pad), dtype),
            grid_spec=pltpu.PrefetchScalarGridSpec(
                num_scalar_prefetch=0,
                grid=(num_row_blocks,),
                in_specs=[
                    # x row tile: streamed, regime-aware buffer depth.
                    pl.BlockSpec((tm_eff, d_pad), lambda i: (i, 0),
                                 pipeline_mode=pl.Buffered(x_nbuf)),
                    # Weight: constant index_map -> resident, single-buffered.
                    pl.BlockSpec((d_pad, d_pad), lambda i: (0, 0),
                                 pipeline_mode=pl.Buffered(1)),
                    # Bias: resident, single-buffered.
                    pl.BlockSpec((1, d_pad), lambda i: (0, 0),
                                 pipeline_mode=pl.Buffered(1)),
                ],
                out_specs=pl.BlockSpec((tm_eff, d_pad), lambda i: (i, 0)),
            ),
            compiler_params=pltpu.CompilerParams(
                dimension_semantics=("parallel",),  # rows shard across TCs (v7x)
                vmem_limit_bytes=vmem_limit,
            ),
            cost_estimate=cost,
        )(x2, w_p, b2)
    else:
        # K-tiled fallback (large D / v7x 64 MiB per-TC VMEM).
        # TODO(synk): for small-N, weight-load-dominated calls on v7x, shard W's
        # output columns across the two TensorCores (or stage W in VMEM_SHARED)
        # instead of row-parallel, halving weight DMA traffic per core.
        tk = 512 if d_pad % 512 == 0 else (256 if d_pad % 256 == 0 else 128)
        tn = tk
        tm_t = max(sublane, min(256, _round_up(N, sublane)))

        def _tiled_need(t):
            return (itemsize * (2 * t * tk + 2 * tk * tn + 2 * t * tn
                                + 2 * tn + 2 * t * tn)
                    + 4 * t * tn)  # f32 accumulator

        while _tiled_need(tm_t) + headroom > vmem_budget and tm_t > sublane:
            tm_t = _round_up(max(sublane, tm_t // 2), sublane)

        vmem_limit = int(min(max(_tiled_need(tm_t) + headroom, 32 << 20),
                             vmem_budget))
        kernel = functools.partial(_residual_linear_tiled_kernel,
                                   precision=precision)
        out = pl.pallas_call(
            kernel,
            out_shape=jax.ShapeDtypeStruct((N, d_pad), dtype),
            grid_spec=pltpu.PrefetchScalarGridSpec(
                num_scalar_prefetch=0,
                grid=(-(-N // tm_t), d_pad // tn, d_pad // tk),
                in_specs=[
                    pl.BlockSpec((tm_t, tk), lambda i, j, k: (i, k)),   # x (lhs)
                    pl.BlockSpec((tk, tn), lambda i, j, k: (k, j)),     # W
                    pl.BlockSpec((tm_t, tn), lambda i, j, k: (i, j)),   # x (residual)
                    pl.BlockSpec((1, tn), lambda i, j, k: (0, j)),      # bias
                ],
                out_specs=pl.BlockSpec((tm_t, tn), lambda i, j, k: (i, j)),
                scratch_shapes=[pltpu.VMEM((tm_t, tn), jnp.float32)],
            ),
            compiler_params=pltpu.CompilerParams(
                dimension_semantics=("parallel", "parallel", "arbitrary"),
                vmem_limit_bytes=vmem_limit,
            ),
            cost_estimate=cost,
        )(x2, w_p, x2, b2)

    if d_pad != D:
        out = out[:, :D]
    return out.reshape(orig_shape)


def _reference(x, w, b, precision=None):
    # Pure-JAX reference of Residual(Linear): fn(x) + x
    return jnp.einsum("...d,de->...e", x, w, precision=precision) + b + x


if __name__ == "__main__":
    key = jax.random.PRNGKey(0)
    kx, kw, kb = jax.random.split(key, 3)

    batch, seq, hidden = 2, 8, 32
    x = jax.random.normal(kx, (batch, seq, hidden), dtype=jnp.float32)

    # Deterministic params mimicking nn.Linear init: uniform(-1/sqrt(D), 1/sqrt(D)).
    # PyTorch's weight is (out, in) and computes x @ W^T; we store W^T directly
    # as an (in, out) matrix so the kernel does x @ w.
    bound = 1.0 / math.sqrt(hidden)
    w = jax.random.uniform(kw, (hidden, hidden), jnp.float32, -bound, bound)
    b = jax.random.uniform(kb, (hidden,), jnp.float32, -bound, bound)

    # f32 path (resident-weight fast path, HIGHEST matmul precision).
    y = jax.block_until_ready(residual_linear(x, w, b))
    y_ref = _reference(x, w, b, precision=jax.lax.Precision.HIGHEST)
    assert y.shape == x.shape and y.dtype == x.dtype
    assert jnp.allclose(y, y_ref, atol=1e-5, rtol=1e-5), "f32 mismatch vs reference"

    # bf16 path (bandwidth-optimal; f32 accumulation in-kernel).
    xb = x.astype(jnp.bfloat16)
    wb = w.astype(jnp.bfloat16)
    bb = b.astype(jnp.bfloat16)
    yb = jax.block_until_ready(residual_linear(xb, wb, bb))
    yb_ref = _reference(xb.astype(jnp.float32), wb.astype(jnp.float32),
                        bb.astype(jnp.float32))
    assert yb.shape == x.shape and yb.dtype == jnp.bfloat16
    assert jnp.allclose(yb.astype(jnp.float32), yb_ref, atol=5e-2, rtol=5e-2), \
        "bf16 mismatch vs reference"

    # Exercise the K-tiled fallback path (what large-D / v7x would use), at a
    # small shape where the K and output-column grids have multiple steps.
    k2x, k2w, k2b = jax.random.split(jax.random.PRNGKey(1), 3)
    D2, N2 = 384, 64
    bound2 = 1.0 / math.sqrt(D2)
    x2 = jax.random.normal(k2x, (N2, D2), dtype=jnp.float32)
    w2 = jax.random.uniform(k2w, (D2, D2), jnp.float32, -bound2, bound2)
    b2 = jax.random.uniform(k2b, (D2,), jnp.float32, -bound2, bound2)
    y2 = jax.block_until_ready(residual_linear(x2, w2, b2, force_tiled=True))
    y2_ref = _reference(x2, w2, b2, precision=jax.lax.Precision.HIGHEST)
    assert jnp.allclose(y2, y2_ref, atol=1e-4, rtol=1e-4), \
        "tiled-path mismatch vs reference"

    print("KERNEL_OK")
</pallas_src>

<mosaic_0001>
module attributes {stable_mosaic.version = 11 : i64} {
  func.func @_residual_linear_resident_kernel(%arg0: i32, %arg1: memref<8x128xf32, #tpu.memory_space<vmem>>, %arg2: memref<128x128xf32, #tpu.memory_space<vmem>>, %arg3: memref<1x128xf32, #tpu.memory_space<vmem>>, %arg4: memref<8x128xf32, #tpu.memory_space<vmem>>) attributes {dimension_semantics = [#tpu.dimension_semantics<parallel>], iteration_bounds = array<i64: 2>, scalar_prefetch = 0 : i64, scratch_operands = 0 : i64, tpu.core_type = #tpu.core_type<tc>, window_params = [{pipeline_mode = #tpu.pipeline_mode<double_buffered>, transform_indices = @transform_0, window_bounds = array<i64: 8, 128>}, {pipeline_mode = #tpu.pipeline_mode<synchronous>, transform_indices = @transform_1, window_bounds = array<i64: 128, 128>}, {pipeline_mode = #tpu.pipeline_mode<synchronous>, transform_indices = @transform_2, window_bounds = array<i64: 1, 128>}, {transform_indices = @transform_3, window_bounds = array<i64: 8, 128>}]} {
    %c0 = arith.constant 0 : index
    %c0_0 = arith.constant 0 : index
    %0 = vector.load %arg1[%c0, %c0_0] : memref<8x128xf32, #tpu.memory_space<vmem>>, vector<8x128xf32>
    %c0_1 = arith.constant 0 : index
    %c0_2 = arith.constant 0 : index
    %1 = vector.load %arg2[%c0_1, %c0_2] : memref<128x128xf32, #tpu.memory_space<vmem>>, vector<128x128xf32>
    %cst = arith.constant dense<0.000000e+00> : vector<8x128xf32>
    %2 = tpu.matmul %0, %1, %cst {dimension_numbers = #tpu.dot_dimension_numbers<[1], [0], [0], [1], [0, 0, 1, 1], [], []>, precision = #tpu.contract_precision<fp32>} : vector<8x128xf32>, vector<128x128xf32>, vector<8x128xf32> -> vector<8x128xf32>
    %c0_3 = arith.constant 0 : index
    %c0_4 = arith.constant 0 : index
    %3 = vector.load %arg3[%c0_3, %c0_4] : memref<1x128xf32, #tpu.memory_space<vmem>>, vector<1x128xf32>
    %4 = vector.broadcast %3 : vector<1x128xf32> to vector<8x128xf32>
    %5 = arith.addf %2, %4 : vector<8x128xf32>
    %6 = arith.addf %5, %0 : vector<8x128xf32>
    %c0_5 = arith.constant 0 : index
    %c0_6 = arith.constant 0 : index
    %7 = vector.load %arg4[%c0_5, %c0_6] : memref<8x128xf32, #tpu.memory_space<vmem>>, vector<8x128xf32>
    tpu.vector_store %arg4[%c0_5, %c0_6], %6 {strides = array<i32>} : memref<8x128xf32, #tpu.memory_space<vmem>>, vector<8x128xf32>,
    return
  }
  func.func @transform_0(%arg0: i32) -> (i32, i32) {
    %c0_i32 = arith.constant 0 : i32
    %c0_i32_0 = arith.constant 0 : i32
    return %arg0, %c0_i32 : i32, i32
  }
  func.func @transform_1(%arg0: i32) -> (i32, i32) {
    %c0_i32 = arith.constant 0 : i32
    %c0_i32_0 = arith.constant 0 : i32
    %c0_i32_1 = arith.constant 0 : i32
    return %c0_i32, %c0_i32_0 : i32, i32
  }
  func.func @transform_2(%arg0: i32) -> (i32, i32) {
    %c0_i32 = arith.constant 0 : i32
    %c0_i32_0 = arith.constant 0 : i32
    %c0_i32_1 = arith.constant 0 : i32
    return %c0_i32, %c0_i32_0 : i32, i32
  }
  func.func @transform_3(%arg0: i32) -> (i32, i32) {
    %c0_i32 = arith.constant 0 : i32
    %c0_i32_0 = arith.constant 0 : i32
    return %arg0, %c0_i32 : i32, i32
  }
}

</mosaic_0001>

<bundles_post_ra>
// kernel: tpu_custom_call.1
= control target key start
LH: loop header
LB: loop body
LE: loop exit
PB: predicated region body
PF: predicated region fallthrough
CT: control target
= control target key end

     0   :  { %8 = vsyncpa [#allocation3], 0  ;;  %s2123_s0 = inlined_call_operand.hbm [shape: f32[16,128], index: 0, kind: input, shape index: {}]   ;;  %s2124_s1 = inlined_call_operand.hbm [shape: f32[128,128], index: 1, kind: input, shape index: {}]   ;;  %s2125_s2 = inlined_call_operand.vmem [shape: f32[1,128], index: 2, kind: input, shape index: {}]   ;;  %s2126_s3 = inlined_call_operand.hbm [shape: f32[16,128], index: 3, kind: output, shape index: {}]  }
   0x1   :  { %10 = vsyncpa [#allocation3 + $0x1], 0 }
   0x2   :  { %11 = vsyncpa [#allocation6], 0 }
   0x3   :  { %12 = vsyncpa [#allocation4], 0 }
   0x4   :  { %14 = vsyncpa [#allocation4 + $0x1], 0  ;;  %s1653_s12 = smov 0   ;;  %s1655_s13 = smov 0  }
   0x5   :  { %s1657_s14 = smov 0   ;;  %s1659_s15 = smov 0  }
   0x6 LB: > { %s1674_s16 = sadd.s32 4294967295, %s1623_s15   ;;  %s962_s17 = sadd.s32 4294967294, %s1623_s15   ;;  %s1623_s15 = sphi %s1659_s15, %s2146_s15   ;;  %s1619_s14 = sphi %s1657_s14, %s2145_s14   ;;  %s1615_s13 = sphi %s1655_s13, %s2144_s13   ;;  %s1611_s12 = sphi %s1653_s12, %s2143_s12  }
   0x7   : > { %p40_p0 = scmp.ne.s32.totalorder %s1615_s13, %s1611_s12  ;;  %p2127_p1 = scmp.eq.s32.totalorder %s1674_s16, 0 }
   0x8   : > { %p112_p3 = scmp.eq.s32.totalorder %s962_s17, 1  ;;  %p963_p5 = scmp.ge.s32.totalorder %s1623_s15, 1 }
   0x9   : > { %p1683_p4 = por %p2127_p1, %p40_p0  ;;  %p119_p7 = scmp.lt.s32.totalorder %s1623_s15, 3 }
   0xa   : > { %p1688_p6 = por %p112_p3, %p40_p0  ;;  %s1625_s21 = smov [#allocation5]  }
   0xb   : > { %s2130_s18 = scalar_select %p1683_p4, 1, 0 }
   0xc   : > { %s2131_s19 = scalar_select %p1688_p6, 1, 0 }
   0xd   : > { %p1693_p8 = pnand %p963_p5, %p119_p7  ;;  %s131_s22 = sshll.u32 %s1625_s21, 4  ;;  %s1697_s22 = int_to_ptr.vmem [resolvable:$true] %s131_s22 }
   0xe   : > { %s1709_s24 = sadd.s32 1, %s1623_s15   ;;  %s27_s25 = sadd.s32 1, %s1619_s14 }
   0xf   : > { %s2132_s20 = scalar_select %p1693_p8, 1, 0 }
  0x10   : > { %p1441_p9 = pneg %p1693_p8  ;;  %s24_s26 = ssub.s32 %s1623_s15, %s1709_s24 }
  0x11   : > { %s1495_s29 = scalar_lea.hbm %s2124_s1, 2048 }
  0x12   : > { %p1704_p11 = pnand %p1441_p9, %p2127_p1  ;;  %p1496_p12 = scmp.ne.s32.totalorder %s2124_s1, %s1495_s29 }
  0x13   : > { %p1502_p5 = scmp.lt.u32.totalorder %s1495_s29, %s2124_s1 }
  0x14   : > { %p1497_p13 = pneg %p1704_p11 }
  0x16   : > { %p1498_p0 = pnand %p1497_p13, %p1496_p12 }
  0x18   : > { %p1499_p3 = pneg %p1498_p0 }
  0x1a   : > { %p1504_p7 = pnand %p1502_p5, %p1499_p3 }
  0x1c   : > { %1507 = shalt.err (!%p1504_p7)
}
  0x1d   : > { %s1508_s7 = scalar_lea.vmem %s1697_s22, 2048  ;;  %p1516_p2 = scmp.lt.s32.totalorder %s1697_s22, %s1697_s22 }
  0x1e   : > { %p1509_p9 = scmp.ne.s32.totalorder %s1697_s22, %s1508_s7  ;;  %p1517_p6 = scmp.lt.s32.totalorder %s1508_s7, %s1508_s7 }
  0x20   : > { %p1511_p10 = pnand %p1509_p9, %p1497_p13  ;;  %p1518_p4 = por %p1517_p6, %p1516_p2 }
  0x22   : > { %p1512_p1 = pneg %p1511_p10 }
  0x24   : > { %p1519_p8 = pnand %p1518_p4, %p1512_p1 }
  0x26   : > { %1522 = shalt.err (!%p1519_p8)
}
  0x27   : > { %s1626_s8 = smov 128   ;;  %s1627_s9 = smov 8  }
  0x28   : > { %1444 = dma.hbm_to_vmem [thread:$0]  (!%p1704_p11), %s2124_s1, 2048, %s1697_s22, [#allocation6], %s1626_s8, %s1626_s8, %s1627_s9  }
  0x29   : > { %p25_p2 = scmp.eq.s32.totalorder %s24_s26, 0  ;;  %p34_p1 = scmp.ne.s32.totalorder %s1619_s14, %s1615_s13 }
  0x2a   : > { %p35_p4 = scmp.eq.s32.totalorder %s1623_s15, 0  ;;  %p1454_p6 = scmp.lt.s32.totalorder %s1623_s15, 2 }
  0x2b   : > { %s1740_s17 = scalar_select %p25_p2, %s1619_s14, %s27_s25  }
  0x2c   : > { %p36_p8 = por %p35_p4, %p34_p1  ;;  %p2134_p10 = scmp.eq.s32.totalorder %s1674_s16, 1 }
  0x2d   : > { %s148_s27 = sand.u32 1, %s1619_s14   ;;  %s967_s28 = sshll.u32 %s1623_s15, 7 }
  0x2e   : > { %p1744_p12 = por %p2134_p10, %p34_p1  ;;  %s966_s29 = sshll.u32 %s148_s27, 3 }
  0x2f   : > { %s1753_s4 = scalar_lea.hbm %s2123_s0, %s967_s28  ;;  %s152_s22 = scalar_lea.vmem [#allocation2], %s966_s29 }
  0x30   : > { %s159_s25 = sshll.u32 %s152_s22, 4  ;;  %p1755_p11 = pnand %p1454_p6, %p36_p8  ;;  %s1759_s25 = int_to_ptr.vmem [resolvable:$true] %s159_s25 }
  0x31   : > { %s149_s5 = scalar_lea.sflag [#allocation3], %s148_s27  ;;  %s1523_s6 = scalar_lea.hbm %s1753_s4, 128 }
  0x32   : > { %p1524_p13 = scmp.ne.s32.totalorder %s1753_s4, %s1523_s6  ;;  %p1525_p0 = pneg %p1755_p11 }
  0x33   : > { %s1528_s9 = scalar_lea.hbm %s2123_s0, 256  ;;  %p1529_p7 = scmp.lt.u32.totalorder %s1753_s4, %s2123_s0 }
  0x34   : > { %p1526_p3 = pnand %p1525_p0, %p1524_p13  ;;  %p1530_p9 = scmp.lt.u32.totalorder %s1528_s9, %s1523_s6 }
  0x35   : > { %p1532_p1 = scmp.lt.u32.totalorder %s1523_s6, %s1753_s4 }
  0x36   : > { %p1527_p5 = pneg %p1526_p3  ;;  %p1531_p2 = por %p1530_p9, %p1529_p7 }
  0x38   : > { %p1533_p4 = por %p1532_p1, %p1531_p2 }
  0x3a   : > { %p1534_p6 = pnand %p1533_p4, %p1527_p5 }
  0x3c   : > { %1537 = shalt.err (!%p1534_p6)
}
  0x3d   : > { %s1538_s27 = scalar_lea.vmem %s1759_s25, 128  ;;  %s1628_s28 = smov [#allocation2]  }
  0x3e   : > { %p1539_p8 = scmp.ne.s32.totalorder %s1759_s25, %s1538_s27  ;;  %s1543_s29 = sshll.u32 %s1628_s28, 4  ;;  %s1544_s29 = int_to_ptr.vmem [resolvable:$false] %s1543_s29 }
  0x3f   : > { %s1545_s23 = scalar_lea.vmem %s1544_s29, 256  ;;  %p1546_p3 = scmp.lt.s32.totalorder %s1759_s25, %s1544_s29 }
  0x40   : > { %p1541_p10 = pnand %p1539_p8, %p1525_p0  ;;  %p1547_p7 = scmp.lt.s32.totalorder %s1545_s23, %s1538_s27 }
  0x42   : > { %p1542_p13 = pneg %p1541_p10  ;;  %p1548_p9 = por %p1547_p7, %p1546_p3 }
  0x44   : > { %p1549_p2 = pnand %p1548_p9, %p1542_p13 }
  0x46   : > { %1552 = shalt.err (!%p1549_p2)
}
  0x47   : > { %1448 = dma.hbm_to_vmem [thread:$0]  (!%p1755_p11), %s1753_s4, 128, %s1759_s25, %s149_s5  }
  0x48   : > { %p2137_p5 = scmp.ne.s32.totalorder %s2132_s20, 0 }
  0x49   : > { %s1789_s30 = sand.u32 (!%p2137_p5), 1, %s1615_s13   ;;  %p2138_p0 = scmp.ne.s32.totalorder (!%p2137_p5), %s2130_s18, 0 }
  0x4a   : > { %168 = sbr.rel (%p2137_p5) target bundleno = 424 (0x1a8), region = 32  ;;  %s969_s22 = sshll.u32 (!%p2137_p5), %s1789_s30, 3 }
  0x4b   : > { %s171_s6 = scalar_lea.sflag (!%p2137_p5), [#allocation3], %s1789_s30  ;;  %s1795_s7 = scalar_lea.vmem (!%p2137_p5), [#allocation2], %s969_s22 }
  0x51   : > { %1598 = dma.done.wait (%p2138_p0), %s171_s6, 128  }
  0x52   : > { %1600 = vsyncadd (%p2138_p0), %s171_s6, 4294967168  ;;  %p2139_p11 = scmp.eq.s32.totalorder %s1674_s16, 0 }
  0x54   : > { %1602 = dma.done.wait (%p2139_p11), [#allocation6], 2048   ;;  %p2140_p1 = pmov %p2139_p11 }
  0x55   : > { %v1629_v0 = vmov 0.0|0.0   ;;  %vm1630_vm0 = vmmov 0   ;;  %v1631_v1 = vmov 0.0   ;;  %v202_v2 = vld [vmem:[#allocation5] sm:$0xff]  ;;  %v203_v3 = vld [vmem:[#allocation5 + $0x8] sm:$0xff]  ;;  %v204_v4 = vld [vmem:[#allocation5 + $0x10] sm:$0xff] }
  0x56   : > { %1604 = vsyncadd (%p2140_p1), [#allocation6], 4294965248  ;;  %1289 = vmatprep.subr.bf16.mxu0 %v1629_v0  ;;  %1313 = vmatprep.subr.bf16.mxu1 %v1629_v0  ;;  %v226_v5 = vand.u32 4294901760, %v202_v2  ;;  %v229_v6 = vand.u32 4294901760, %v203_v3  ;;  %v205_v7 = vld [vmem:[#allocation5 + $0x18] sm:$0xff]  ;;  %v232_v8 = vand.u32 4294901760, %v204_v4 }
  0x57   : > { %1111 = vmatprep.mubr.msk.f32.mxu0 %vm1630_vm0, %v1631_v1  ;;  %1146 = vmatprep.mubr.msk.f32.mxu1 %vm1630_vm0, %v1631_v1  ;;  %v206_v9 = vld [vmem:[#allocation5 + $0x20] sm:$0xff]  ;;  %v207_v10 = vld [vmem:[#allocation5 + $0x28] sm:$0xff]  ;;  %v235_v11 = vand.u32 4294901760, %v205_v7  ;;  %v208_v14 = vld [vmem:[#allocation5 + $0x30] sm:$0xff]  ;;  %s974_s4 = sshll.u32 %s1674_s16, 7  ;;  %s200_s25 = scalar_lea.vmem [#allocation7], %s969_s22 }
  0x58   : > { %v238_v12 = vand.u32 4294901760, %v206_v9  ;;  %v241_v13 = vand.u32 4294901760, %v207_v10  ;;  %v1811_v15 = vpack.c.bf16 %v229_v6, %v226_v5  ;;  %v1813_v16 = vsub.f32 %v202_v2, %v226_v5  ;;  %v209_v19 = vld [vmem:[#allocation5 + $0x38] sm:$0xff]  ;;  %v210_v20 = vld [vmem:[#allocation5 + $0x40] sm:$0xff]  ;;  %v211_v27 = vld [vmem:[#allocation5 + $0x48] sm:$0xff]  ;;  %s882_s26 = sshll.u32 %s200_s25, 4  ;;  %s2079_s9 = scalar_lea.hbm %s2126_s3, %s974_s4  ;;  %s2081_s26 = int_to_ptr.vmem [resolvable:$true] %s882_s26 }
  0x59   : > { %v1815_v17 = vsub.f32 %v203_v3, %v229_v6  ;;  %v1817_v18 = vsub.f32 %v204_v4, %v232_v8  ;;  %v1819_v21 = vpack.c.bf16 %v235_v11, %v232_v8  ;;  %v1821_v22 = vsub.f32 %v205_v7, %v235_v11  ;;  %v212_v40 = vld [vmem:[#allocation5 + $0x50] sm:$0xff]  ;;  %v213_v41 = vld [vmem:[#allocation5 + $0x58] sm:$0xff]  ;;  %v214_v50 = vld [vmem:[#allocation5 + $0x60] sm:$0xff]  ;;  %s869_s10 = scalar_lea.sflag [#allocation4], %s1789_s30  ;;  %s1553_s16 = scalar_lea.vmem %s2081_s26, 128 }
  0x5a   : > { %1291 = vmatpush3.bf16.msra.mxu0 %v1811_v15  ;;  %v1824_v23 = vsub.f32 %v206_v9, %v238_v12  ;;  %v319_v24 = vand.u32 4294901760, %v1813_v16  ;;  %v244_v26 = vand.u32 4294901760, %v208_v14  ;;  %v247_v28 = vand.u32 4294901760, %v209_v19  ;;  %v215_v59 = vld [vmem:[#allocation5 + $0x68] sm:$0xff]  ;;  %v216_v2 = vld [vmem:[#allocation5 + $0x70] sm:$0xff]  ;;  %v217_v7 = vld [vmem:[#allocation5 + $0x78] sm:$0xff]  ;;  %p1554_p4 = scmp.ne.s32.totalorder %s2081_s26, %s1553_s16 }
  0x5b   : > { %v326_v25 = vand.u32 4294901760, %v1815_v17  ;;  %1292 = vmatprep.subr.bf16.mxu0 %v1629_v0  ;;  %v333_v29 = vand.u32 4294901760, %v1817_v18  ;;  %v340_v30 = vand.u32 4294901760, %v1821_v22  ;;  %v250_v31 = vand.u32 4294901760, %v210_v20  ;;  %s1632_s11 = smov [#allocation7]  }
  0x5c   : > { %v1831_v32 = vsub.f32 %v207_v10, %v241_v13  ;;  %v320_v33 = vsub.f32 %v1813_v16, %v319_v24  ;;  %v1839_v35 = vsub.f32 %v208_v14, %v244_v26  ;;  %v1841_v36 = vsub.f32 %v209_v19, %v247_v28  ;;  %p1555_p6 = pnand %p1554_p4, %p1744_p12  ;;  %s1557_s27 = sshll.u32 %s1632_s11, 4  ;;  %s1558_s27 = int_to_ptr.vmem [resolvable:$false] %s1557_s27 }
  0x5d   : > { %v327_v34 = vsub.f32 %v1815_v17, %v326_v25  ;;  %v334_v37 = vsub.f32 %v1817_v18, %v333_v29  ;;  %v341_v38 = vsub.f32 %v1821_v22, %v340_v30  ;;  %v253_v39 = vand.u32 4294901760, %v211_v27  ;;  %s1559_s28 = scalar_lea.vmem %s1558_s27, 256  ;;  %p1560_p10 = scmp.lt.s32.totalorder %s2081_s26, %s1558_s27 }
  0x5e   : > { %1294 = vmatpush3.bf16.msra.mxu0 %v1819_v21  ;;  %v1850_v42 = vpack.c.bf16 %v241_v13, %v238_v12  ;;  %v321_v43 = vand.u32 4294901760, %v320_v33  ;;  %v1852_v45 = vpack.c.bf16 %v247_v28, %v244_v26  ;;  %v1855_v48 = vsub.f32 %v210_v20, %v250_v31  ;;  %p1556_p8 = pneg %p1555_p6  ;;  %p1561_p13 = scmp.lt.s32.totalorder %s1559_s28, %s1553_s16 }
  0x5f   : > { %v328_v44 = vand.u32 4294901760, %v327_v34  ;;  %1295 = vmatprep.subr.bf16.mxu0 %v1629_v0  ;;  %v335_v46 = vand.u32 4294901760, %v334_v37  ;;  %v342_v47 = vand.u32 4294901760, %v341_v38  ;;  %v347_v49 = vand.u32 4294901760, %v1824_v23 }
  0x60   : > { %v354_v52 = vand.u32 4294901760, %v1831_v32  ;;  %v256_v53 = vand.u32 4294901760, %v212_v40  ;;  %v259_v54 = vand.u32 4294901760, %v213_v41  ;;  %v1859_v55 = vsub.f32 %v211_v27, %v253_v39  ;;  %p1562_p3 = por %p1561_p13, %p1560_p10 }
  0x61   : > { %v1314_v51 = vpack.c.bf16 %v328_v44, %v321_v43  ;;  %v348_v56 = vsub.f32 %v1824_v23, %v347_v49  ;;  %v361_v57 = vand.u32 4294901760, %v1839_v35  ;;  %v368_v58 = vand.u32 4294901760, %v1841_v36 }
  0x62   : > { %1297 = vmatpush3.bf16.msra.mxu0 %v1850_v42  ;;  %v1317_v60 = vpack.c.bf16 %v342_v47, %v335_v46  ;;  %v1867_v61 = vpack.c.bf16 %v253_v39, %v250_v31  ;;  %v355_v62 = vsub.f32 %v1831_v32, %v354_v52  ;;  %v262_v63 = vand.u32 4294901760, %v214_v50  ;;  %v1892_v31 = vld [vmem:[%s1795_s7] sm:$0xff]  ;;  %p1563_p7 = pnand %p1562_p3, %p1556_p8 }
  0x63   : > { %1315 = vmatpush3.bf16.msra.mxu1 %v1314_v51  ;;  %1298 = vmatprep.subr.bf16.mxu0 %v1629_v0  ;;  %v349_v3 = vand.u32 4294901760, %v348_v56  ;;  %v1874_v4 = vsub.f32 %v212_v40, %v256_v53  ;;  %v362_v5 = vsub.f32 %v1839_v35, %v361_v57  ;;  %v369_v6 = vsub.f32 %v1841_v36, %v368_v58 }
  0x64   : > { %1316 = vmatprep.subr.bf16.mxu1 %v1629_v0  ;;  %v356_v8 = vand.u32 4294901760, %v355_v62  ;;  %v1882_v9 = vsub.f32 %v213_v41, %v259_v54  ;;  %v265_v10 = vand.u32 4294901760, %v215_v59  ;;  %v375_v11 = vand.u32 4294901760, %v1855_v48 }
  0x65   : > { %v363_v12 = vand.u32 4294901760, %v362_v5  ;;  %v370_v13 = vand.u32 4294901760, %v369_v6  ;;  %v382_v14 = vand.u32 4294901760, %v1859_v55  ;;  %v268_v19 = vand.u32 4294901760, %v216_v2 }
  0x66   : > { %1300 = vmatpush3.bf16.msra.mxu0 %v1852_v45  ;;  %v1320_v20 = vpack.c.bf16 %v356_v8, %v349_v3  ;;  %v1887_v26 = vsub.f32 %v214_v50, %v262_v63  ;;  %v1889_v27 = vsub.f32 %v215_v59, %v265_v10  ;;  %v271_v28 = vand.u32 4294901760, %v217_v7 }
  0x67   : > { %1318 = vmatpush3.bf16.msra.mxu1 %v1317_v60  ;;  %1301 = vmatprep.subr.bf16.mxu0 %v1629_v0  ;;  %v376_v33 = vsub.f32 %v1855_v48, %v375_v11  ;;  %v383_v34 = vsub.f32 %v1859_v55, %v382_v14  ;;  %v389_v37 = vand.u32 4294901760, %v1874_v4  ;;  %v1903_v38 = vpack.c.bf16 %v259_v54, %v256_v53 }
  0x68   : > { %1319 = vmatprep.subr.bf16.mxu1 %v1629_v0  ;;  %v1323_v39 = vpack.c.bf16 %v370_v13, %v363_v12  ;;  %v1905_v40 = vsub.f32 %v216_v2, %v268_v19  ;;  %v396_v41 = vand.u32 4294901760, %v1882_v9  ;;  %v1912_v47 = vand.u32 4294901760, %v1892_v31 }
  0x69   : > { %v377_v43 = vand.u32 4294901760, %v376_v33  ;;  %v384_v44 = vand.u32 4294901760, %v383_v34  ;;  %v390_v46 = vsub.f32 %v1874_v4, %v389_v37  ;;  %v1915_v50 = vsub.f32 %v217_v7, %v271_v28 }
  0x6a   : > { %1303 = vmatpush3.bf16.msra.mxu0 %v1867_v61  ;;  %v397_v51 = vsub.f32 %v1882_v9, %v396_v41  ;;  %v403_v53 = vand.u32 4294901760, %v1887_v26  ;;  %v410_v54 = vand.u32 4294901760, %v1889_v27  ;;  %v1926_v56 = vsub.f32 %v1892_v31, %v1912_v47 }
  0x6b   : > { %1321 = vmatpush3.bf16.msra.mxu1 %v1320_v20  ;;  %1304 = vmatprep.subr.bf16.mxu0 %v1629_v0  ;;  %v1928_v59 = vpack.c.bf16 %v265_v10, %v262_v63  ;;  %v1326_v60 = vpack.c.bf16 %v384_v44, %v377_v43  ;;  %v391_v62 = vand.u32 4294901760, %v390_v46  ;;  %v417_v3 = vand.u32 4294901760, %v1905_v40 }
  0x6c   : > { %1322 = vmatprep.subr.bf16.mxu1 %v1629_v0  ;;  %v308_v2 = vand.u32 4294901760, %v1926_v56  ;;  %v398_v5 = vand.u32 4294901760, %v397_v51  ;;  %v404_v6 = vsub.f32 %v1887_v26, %v403_v53  ;;  %v411_v7 = vsub.f32 %v1889_v27, %v410_v54 }
  0x6d   : > { %v424_v63 = vand.u32 4294901760, %v1915_v50  ;;  %v1942_v8 = vpack.c.bf16 %v271_v28, %v268_v19  ;;  %v418_v12 = vsub.f32 %v1905_v40, %v417_v3  ;;  %v1341_v51 = vpack.c.bf16 %v1821_v22, %v1817_v18 }
  0x6e   : > { %1306 = vmatpush3.bf16.msra.mxu0 %v1903_v38  ;;  %v309_v10 = vsub.f32 %v1926_v56, %v308_v2  ;;  %v1329_v13 = vpack.c.bf16 %v398_v5, %v391_v62  ;;  %v405_v20 = vand.u32 4294901760, %v404_v6  ;;  %v412_v33 = vand.u32 4294901760, %v411_v7 }
  0x6f   : > { %1324 = vmatpush3.bf16.msra.mxu1 %v1323_v39  ;;  %1307 = vmatprep.subr.bf16.mxu0 %v1629_v0  ;;  %v425_v34 = vsub.f32 %v1915_v50, %v424_v63  ;;  %v1338_v39 = vpack.c.bf16 %v1815_v17, %v1813_v16  ;;  %v419_v43 = vand.u32 4294901760, %v418_v12  ;;  %v1347_v62 = vpack.c.bf16 %v1841_v36, %v1839_v35 }
  0x70   : > { %1325 = vmatprep.subr.bf16.mxu1 %v1629_v0  ;;  %v310_v19 = vand.u32 4294901760, %v309_v10  ;;  %v1332_v28 = vpack.c.bf16 %v412_v33, %v405_v20  ;;  %v1350_v5 = vpack.c.bf16 %v1859_v55, %v1855_v48  ;;  %v1353_v6 = vpack.c.bf16 %v1882_v9, %v1874_v4 }
  0x71   : > { %v426_v44 = vand.u32 4294901760, %v425_v34  ;;  %v1356_v7 = vpack.c.bf16 %v1889_v27, %v1887_v26  ;;  %v1359_v10 = vpack.c.bf16 %v1915_v50, %v1905_v40  ;;  %v1386_v12 = vpack.c.bf16 %v326_v25, %v319_v24  ;;  %v972_v24 = vld [vmem:[%s2125_s2] ss:$0 sm:$0xff] }
  0x72   : > { %1309 = vmatpush3.bf16.msra.mxu0 %v1928_v59  ;;  %v1392_v16 = vpack.c.bf16 %v354_v52, %v347_v49  ;;  %v1395_v17 = vpack.c.bf16 %v368_v58, %v361_v57  ;;  %v1404_v18 = vpack.c.bf16 %v410_v54, %v403_v53 }
  0x73   : > { %1327 = vmatpush3.bf16.msra.mxu1 %v1326_v60  ;;  %1310 = vmatprep.subr.bf16.mxu0 %v1629_v0  ;;  %v1335_v46 = vpack.c.bf16 %v426_v44, %v419_v43  ;;  %v1344_v60 = vpack.c.bf16 %v1831_v32, %v1824_v23 }
  0x74   : > { %1328 = vmatprep.subr.bf16.mxu1 %v1629_v0 }
  0x76   : > { %1312 = vmatpush3.bf16.msra.mxu0 %v1942_v8 }
  0x77   : > { %1330 = vmatpush3.bf16.msra.mxu1 %v1329_v13  ;;  %1337 = vmatprep.subr.bf16.mxu0 %v1629_v0  ;;  %v1389_v13 = vpack.c.bf16 %v340_v30, %v333_v29 }
  0x78   : > { %1331 = vmatprep.subr.bf16.mxu1 %v1629_v0 }
  0x79   : > { %1112 = vmatmul.mubr.f32.vlgmr.msra.gmra.mrb[0].mxu0 %v310_v19 }
  0x7a   : > { %1339 = vmatpush3.bf16.msra.mxu0 %v1338_v39  ;;  %1181 = vmatprep.mubr.msk.f32.mxu0 %vm1630_vm0, %v1631_v1 }
  0x7b   : > { %1333 = vmatpush3.bf16.msra.mxu1 %v1332_v28  ;;  %1340 = vmatprep.subr.bf16.mxu0 %v1629_v0 }
  0x7c   : > { %1334 = vmatprep.subr.bf16.mxu1 %v1629_v0 }
  0x7e   : > { %1342 = vmatpush3.bf16.msra.mxu0 %v1341_v51 }
  0x7f   : > { %1336 = vmatpush3.bf16.msra.mxu1 %v1335_v46  ;;  %1343 = vmatprep.subr.bf16.mxu0 %v1629_v0 }
  0x80   : > { %1361 = vmatprep.subr.bf16.mxu1 %v1629_v0 }
  0x82   : > { %1147 = vmatmul.mubr.f32.vlgmr.msra.gmra.mrb[0].mxu1 %v1912_v47  ;;  %1345 = vmatpush3.bf16.msra.mxu0 %v1344_v60 }
  0x83   : > { %1363 = vmatpush3.bf16.msra.mxu1 %v1811_v15  ;;  %1346 = vmatprep.subr.bf16.mxu0 %v1629_v0 }
  0x84   : > { %1364 = vmatprep.subr.bf16.mxu1 %v1629_v0  ;;  %1216 = vmatprep.mubr.msk.f32.mxu1 %vm1630_vm0, %v1631_v1 }
  0x86   : > { %1348 = vmatpush3.bf16.msra.mxu0 %v1347_v62 }
  0x87   : > { %1366 = vmatpush3.bf16.msra.mxu1 %v1819_v21  ;;  %1349 = vmatprep.subr.bf16.mxu0 %v1629_v0 }
  0x88   : > { %1367 = vmatprep.subr.bf16.mxu1 %v1629_v0 }
  0x8a   : > { %1351 = vmatpush3.bf16.msra.mxu0 %v1350_v5 }
  0x8b   : > { %1369 = vmatpush3.bf16.msra.mxu1 %v1850_v42  ;;  %1352 = vmatprep.subr.bf16.mxu0 %v1629_v0 }
  0x8c   : > { %1370 = vmatprep.subr.bf16.mxu1 %v1629_v0 }
  0x8e   : > { %1354 = vmatpush3.bf16.msra.mxu0 %v1353_v6 }
  0x8f   : > { %1372 = vmatpush3.bf16.msra.mxu1 %v1852_v45  ;;  %1355 = vmatprep.subr.bf16.mxu0 %v1629_v0 }
  0x90   : > { %1373 = vmatprep.subr.bf16.mxu1 %v1629_v0 }
  0x92   : > { %1357 = vmatpush3.bf16.msra.mxu0 %v1356_v7 }
  0x93   : > { %1375 = vmatpush3.bf16.msra.mxu1 %v1867_v61  ;;  %1358 = vmatprep.subr.bf16.mxu0 %v1629_v0 }
  0x94   : > { %1376 = vmatprep.subr.bf16.mxu1 %v1629_v0 }
  0x96   : > { %1360 = vmatpush3.bf16.msra.mxu0 %v1359_v10 }
  0x97   : > { %1378 = vmatpush3.bf16.msra.mxu1 %v1903_v38  ;;  %1385 = vmatprep.subr.bf16.mxu0 %v1629_v0 }
  0x98   : > { %1379 = vmatprep.subr.bf16.mxu1 %v1629_v0 }
  0x99   : > { %1182 = vmatmul.mubr.f32.vlgmr.msra.gmra.mrb[2].mxu0 %v1926_v56 }
  0x9a   : > { %1387 = vmatpush3.bf16.msra.mxu0 %v1386_v12  ;;  %1251 = vmatprep.mubr.msk.f32.mxu0 %vm1630_vm0, %v1631_v1 }
  0x9b   : > { %1381 = vmatpush3.bf16.msra.mxu1 %v1928_v59  ;;  %1388 = vmatprep.subr.bf16.mxu0 %v1629_v0 }
  0x9c   : > { %1382 = vmatprep.subr.bf16.mxu1 %v1629_v0 }
  0x9e   : > { %1390 = vmatpush3.bf16.msra.mxu0 %v1389_v13 }
  0x9f   : > { %1384 = vmatpush3.bf16.msra.mxu1 %v1942_v8  ;;  %1391 = vmatprep.subr.bf16.mxu0 %v1629_v0 }
  0xa0   : > { %1409 = vmatprep.subr.bf16.mxu1 %v1629_v0 }
  0xa2   : > { %1217 = vmatmul.mubr.f32.vlgmr.msra.gmra.mrb[2].mxu1 %v308_v2  ;;  %1393 = vmatpush3.bf16.msra.mxu0 %v1392_v16 }
  0xa3   : > { %1411 = vmatpush3.bf16.msra.mxu1 %v1811_v15  ;;  %1394 = vmatprep.subr.bf16.mxu0 %v1629_v0  ;;  %v1398_v15 = vpack.c.bf16 %v382_v14, %v375_v11 }
  0xa4   : > { %1412 = vmatprep.subr.bf16.mxu1 %v1629_v0  ;;  %1286 = vmatprep.mubr.msk.f32.mxu1 %vm1630_vm0, %v1631_v1  ;;  %v1401_v1 = vpack.c.bf16 %v396_v41, %v389_v37 }
  0xa6   : > { %1396 = vmatpush3.bf16.msra.mxu0 %v1395_v17 }
  0xa7   : > { %1414 = vmatpush3.bf16.msra.mxu1 %v1819_v21  ;;  %1397 = vmatprep.subr.bf16.mxu0 %v1629_v0  ;;  %v1407_v21 = vpack.c.bf16 %v424_v63, %v417_v3 }
  0xa8   : > { %1415 = vmatprep.subr.bf16.mxu1 %v1629_v0 }
  0xaa   : > { %1399 = vmatpush3.bf16.msra.mxu0 %v1398_v15 }
  0xab   : > { %1417 = vmatpush3.bf16.msra.mxu1 %v1850_v42  ;;  %1400 = vmatprep.subr.bf16.mxu0 %v1629_v0 }
  0xac   : > { %1418 = vmatprep.subr.bf16.mxu1 %v1629_v0 }
  0xae   : > { %1402 = vmatpush3.bf16.msra.mxu0 %v1401_v1 }
  0xaf   : > { %1420 = vmatpush3.bf16.msra.mxu1 %v1852_v45  ;;  %1403 = vmatprep.subr.bf16.mxu0 %v1629_v0 }
  0xb0   : > { %1421 = vmatprep.subr.bf16.mxu1 %v1629_v0 }
  0xb2   : > { %1405 = vmatpush3.bf16.msra.mxu0 %v1404_v18 }
  0xb3   : > { %1423 = vmatpush3.bf16.msra.mxu1 %v1867_v61  ;;  %1406 = vmatprep.subr.bf16.mxu0 %v1629_v0 }
  0xb4   : > { %1424 = vmatprep.subr.bf16.mxu1 %v1629_v0 }
  0xb6   : > { %1408 = vmatpush3.bf16.msra.mxu0 %v1407_v21 }
  0xb7   : > { %1426 = vmatpush3.bf16.msra.mxu1 %v1903_v38 }
  0xb8   : > { %1427 = vmatprep.subr.bf16.mxu1 %v1629_v0 }
  0xb9   : > { %1252 = vmatmul.mubr.f32.vlgmr.msra.gmra.mrb[4].mxu0 %v1912_v47 }
  0xbb   : > { %1429 = vmatpush3.bf16.msra.mxu1 %v1928_v59 }
  0xbc   : > { %1430 = vmatprep.subr.bf16.mxu1 %v1629_v0 }
  0xbf   : > { %1432 = vmatpush3.bf16.msra.mxu1 %v1942_v8 }
  0xc2   : > { %1287 = vmatmul.mubr.f32.vlgmr.msra.gmra.mrb[4].mxu1 %v1912_v47 }
 0x14c   : > { %v312_v22 = vpop.f32.mrb[0].mxu0 }
 0x14d   : > { %v1113_v23 = vpop.f32.mrb[1].mxu0  ;;  %v313_v25 = vadd.f32 %v972_v24, %v312_v22 }
 0x155   : > { %v463_v29 = vpop.f32.mrb[0].mxu1 }
 0x156   : > { %v464_v30 = vadd.f32 %v463_v29, %v313_v25  ;;  %v1148_v32 = vpop.f32.mrb[1].mxu1 }
 0x16c   : > { %v567_v35 = vpop.f32.mrb[2].mxu0 }
 0x16d   : > { %v568_v36 = vadd.f32 %v567_v35, %v464_v30  ;;  %v1183_v42 = vpop.f32.mrb[3].mxu0 }
 0x175   : > { %v656_v0 = vpop.f32.mrb[2].mxu1 }
 0x176   : > { %v657_v45 = vadd.f32 %v656_v0, %v568_v36  ;;  %v1218_v48 = vpop.f32.mrb[3].mxu1 }
 0x18c   : > { %v775_v49 = vpop.f32.mrb[4].mxu0 }
 0x18d   : > { %v776_v52 = vadd.f32 %v775_v49, %v657_v45  ;;  %v1253_v55 = vpop.f32.mrb[5].mxu0 }
 0x195   : > { %v862_v57 = vpop.f32.mrb[4].mxu1 }
 0x196   : > { %v863_v58 = vadd.f32 %v862_v57, %v776_v52  ;;  %v1288_v61 = vpop.f32.mrb[5].mxu1 }
 0x198   : > { %v866_v4 = vadd.f32 %v863_v58, %v1892_v31 }
 0x19a   : > { %867 = vst [vmem:[%s200_s25] sm:$0xff] %v866_v4 }
 0x19b   : > { %1566 = shalt.err (!%p1563_p7)
}
 0x19c   : > { %s1567_s29 = scalar_lea.hbm %s2079_s9, 128  ;;  %s1571_s22 = scalar_lea.hbm %s2126_s3, 256 }
 0x19d   : > { %p1568_p9 = scmp.ne.s32.totalorder %s2079_s9, %s1567_s29  ;;  %p1572_p0 = scmp.lt.u32.totalorder %s2079_s9, %s2126_s3 }
 0x19e   : > { %p1573_p11 = scmp.lt.u32.totalorder %s1571_s22, %s1567_s29  ;;  %p1575_p4 = scmp.lt.u32.totalorder %s1567_s29, %s2079_s9 }
 0x19f   : > { %p1569_p2 = pnand %p1568_p9, %p1744_p12 }
 0x1a0   : > { %p1574_p1 = por %p1573_p11, %p1572_p0 }
 0x1a1   : > { %p1570_p5 = pneg %p1569_p2 }
 0x1a2   : > { %p1576_p6 = por %p1575_p4, %p1574_p1 }
 0x1a4   : > { %p1577_p8 = pnand %p1576_p6, %p1570_p5 }
 0x1a6   : > { %1580 = shalt.err (!%p1577_p8)
}
 0x1a7   : > { %1439 = dma.vmem_to_hbm [thread:$0]  (%p1744_p12), %s2081_s26, 128, %s2079_s9, %s869_s10  }
 0x1a8 PF: > { %s894_s18 = sand.u32 1, %s1611_s12   ;;  %p2141_p10 = scmp.ne.s32.totalorder %s2131_s19, 0 }
 0x1a9   : > { %p2142_p13 = scmp.ge.s32.totalorder %s1623_s15, 2  ;;  %s895_s20 = scalar_lea.sflag [#allocation4], %s894_s18 }
 0x1ab   : > { %p1450_p3 = pnand %p2142_p13, %p2141_p10 }
 0x1ad   : > { %1606 = dma.done.wait (!%p1450_p3), %s895_s20, 128  }
 0x1ae   : > { %1608 = vsyncadd (!%p1450_p3), %s895_s20, 4294967168  ;;  %p17_p7 = scmp.ge.s32.totalorder %s1709_s24, 4   ;;  %s2143_s12 = smov %s1615_s13 }
 0x1af   : > { %s2144_s13 = smov %s1619_s14  ;;  %s2145_s14 = smov %s1740_s17 }
 0x1b0   : > { %s2146_s15 = smov %s1709_s24  ;;  %19 = sbr.rel (!%p17_p7) target bundleno = 6 (0x6), region = 81 }
 0x1b7   :  { %900 = vsyncpa [#allocation3], 1 }
 0x1b8   :  { %902 = vsyncpa [#allocation3 + $0x1], 1 }
 0x1b9   :  { %903 = vsyncpa [#allocation6], 1 }
 0x1ba   :  { %904 = vsyncpa [#allocation4], 1 }
 0x1bb   :  { %906 = vsyncpa [#allocation4 + $0x1], 1 }

</bundles_post_ra>
